<compile_context>
chip_gen: v6e
topology: v6e:2x2x1
jax: 0.10.0
libtpu: 0.0.40
codegen_flags: <defaults>
</compile_context>

<pallas_src>
import functools
import math

import jax
import jax.numpy as jnp
from jax.experimental import pallas as pl
from jax.experimental.pallas import tpu as pltpu


NEG_SLOPE = 0.01  # F.leaky_relu default negative_slope


def _round_up(n, m):
    return ((n + m - 1) // m) * m


def _leaky_relu(z):
    # keep in f32 on all chips (v5e has no bf16 VPU)
    return jnp.where(z >= 0, z, NEG_SLOPE * z)


# -----------------------------------------------------------------------------
# Kernel
# -----------------------------------------------------------------------------
def _policy_net_kernel(x_ref,
                       w1_ref, b1_ref,
                       w2_ref, b2_ref,
                       wh_ref, bh_ref,      # fused head hidden: (H, 2H), (1, 2H)
                       wpo_ref, bpo_ref,    # policy out: (H, OUT), (1, OUT) [col A carries value bias]
                       wvo_ref,             # value out row: (1, H) f32
                       out_ref,             # bf16 (tm, OUT) lane-dense slab
                       *, action_size):
    # transforms.Normalize(mean=0.5, std=0.5) fused + bf16 cast for the MXU.
    x = (x_ref[...] * 2.0 - 1.0).astype(jnp.bfloat16)                   # (tm, S)

    # trunk: x = leaky_relu(l1(x)); x = leaky_relu(l2(x))
    h = jnp.dot(x, w1_ref[...], preferred_element_type=jnp.float32) + b1_ref[...]
    h = _leaky_relu(h).astype(jnp.bfloat16)
    h = jnp.dot(h, w2_ref[...], preferred_element_type=jnp.float32) + b2_ref[...]
    h = _leaky_relu(h).astype(jnp.bfloat16)

    # fused policy+value penultimate layer: one (tm, H) x (H, 2H) MXU matmul
    hh = jnp.dot(h, wh_ref[...], preferred_element_type=jnp.float32) + bh_ref[...]
    hh = _leaky_relu(hh)                                                 # f32 (tm, 2H)

    H = wpo_ref.shape[0]
    # policy head: (tm, H) x (H, OUT) matmul into the lane-dense output slab
    pol = jnp.dot(hh[:, :H].astype(jnp.bfloat16), wpo_ref[...],
                  preferred_element_type=jnp.float32) + bpo_ref[...]
    # value head: VPU multiply + XLU lane reduction (both off the MXU slot),
    # merged into column `action_size` (where pol already holds the value bias).
    val = jnp.sum(hh[:, H:] * wvo_ref[...], axis=-1, keepdims=True)     # (tm, 1)
    col = jax.lax.broadcasted_iota(jnp.int32, pol.shape, 1)
    out = pol + jnp.where(col == action_size, val, 0.0)

    out_ref[...] = out.astype(out_ref.dtype)                            # bf16 store


# -----------------------------------------------------------------------------
# Parameter packing (done once, outside the per-step forward)
# -----------------------------------------------------------------------------
def pack_params(params):
    """Fuse the two heads and cast weights to bf16 (biases / value row stay f32)."""
    S, H = params["w1"].shape
    A = params["wpo"].shape[1]
    out_pad = max(128, _round_up(A + 1, 128))          # lane-dense output width

    wh = jnp.concatenate([params["wpp"], params["wvp"]], axis=1)        # (H, 2H)
    bh = jnp.concatenate([params["bpp"], params["bvp"]], axis=1)        # (1, 2H)

    # policy output weight zero-padded to the slab width; column A is zero so
    # the value bias can ride in bpo[:, A].
    wpo = jnp.zeros((H, out_pad), jnp.float32).at[:, :A].set(params["wpo"])
    bpo = jnp.zeros((1, out_pad), jnp.float32).at[:, :A].set(params["bpo"])
    bpo = bpo.at[:, A].set(params["bvo"][:, 0])
    wvo = params["wvo"].T                               # (1, H), f32 for the VPU path

    bf = jnp.bfloat16
    return {
        "w1": params["w1"].astype(bf), "b1": params["b1"],
        "w2": params["w2"].astype(bf), "b2": params["b2"],
        "wh": wh.astype(bf), "bh": bh,
        "wpo": wpo.astype(bf), "bpo": bpo,
        "wvo": wvo,
        "status": S, "hidden": H, "action": A, "out_pad": out_pad,
    }


# -----------------------------------------------------------------------------
# Tile selection
# -----------------------------------------------------------------------------
def _choose_tile(B, S, OUT, tile_m):
    if B < 16:
        return B                                    # single tiny tile (full-dim block)
    if B < tile_m:
        # >= 2 grid steps whenever possible so both v7x TensorCores get work;
        # 16-row granules match bf16 sublane packing.
        return min(B, max(16, _round_up(pl.cdiv(B, 2), 16)))
    # VMEM budget per batch row: double-buffered f32 x + bf16 out tiles plus
    # in-kernel f32/bf16 temporaries.  Stay well under the 32 MiB scoped
    # default (v7x physical VMEM is only 64 MiB, so do not raise it blindly).
    per_row = 2 * 4 * S + 2 * 2 * OUT + 2 * S + 6 * 1024
    cap = max(16, ((24 * 1024 * 1024) // per_row) // 16 * 16)
    tm = min(tile_m, cap, B)
    return max(16, (tm // 16) * 16)


# -----------------------------------------------------------------------------
# Wrapper
# -----------------------------------------------------------------------------
def policy_net_forward(x, packed, tile_m=2048):
    """x: (B, C, H, W) or (C, H, W) float32.  Returns (policy (B, A), value (B, 1)) f32."""
    if x.ndim == 3:
        x = x[None]                                  # torch.unsqueeze(x, dim=0)
    B = x.shape[0]
    x = x.reshape(B, -1)                             # flatten for the MLP stand-in
    S, H = packed["status"], packed["hidden"]
    A, OUT = packed["action"], packed["out_pad"]
    assert x.shape[1] == S

    tm = _choose_tile(B, S, OUT, tile_m)
    grid = (pl.cdiv(B, tm),)                         # Pallas masks the boundary tile
    kernel = functools.partial(_policy_net_kernel, action_size=A)

    # Weights (~0.3 MiB bf16) use constant index_maps so they stay VMEM-resident
    # across grid steps; only x / out stream.  If a trace ever shows exposed DMA
    # at the chosen tm, bump the x/out specs to pipeline_mode=pl.Buffered(3).
    slab = pl.pallas_call(
        kernel,
        out_shape=jax.ShapeDtypeStruct((B, OUT), jnp.bfloat16),
        grid_spec=pltpu.PrefetchScalarGridSpec(
            num_scalar_prefetch=0,
            grid=grid,
            in_specs=[
                pl.BlockSpec((tm, S), lambda i: (i, 0)),         # x: streamed on batch
                pl.BlockSpec((S, H), lambda i: (0, 0)),          # weights: VMEM-resident
                pl.BlockSpec((1, H), lambda i: (0, 0)),
                pl.BlockSpec((H, H), lambda i: (0, 0)),
                pl.BlockSpec((1, H), lambda i: (0, 0)),
                pl.BlockSpec((H, 2 * H), lambda i: (0, 0)),
                pl.BlockSpec((1, 2 * H), lambda i: (0, 0)),
                pl.BlockSpec((H, OUT), lambda i: (0, 0)),
                pl.BlockSpec((1, OUT), lambda i: (0, 0)),
                pl.BlockSpec((1, H), lambda i: (0, 0)),
            ],
            out_specs=pl.BlockSpec((tm, OUT), lambda i: (i, 0)),
        ),
        # "parallel" lets the batch grid shard across v7x's two TensorCores;
        # pltpu.CORE_PARALLEL is the stronger option if profiling shows a TC idle.
        compiler_params=pltpu.CompilerParams(
            dimension_semantics=("parallel",)),
    )(x,
      packed["w1"], packed["b1"],
      packed["w2"], packed["b2"],
      packed["wh"], packed["bh"],
      packed["wpo"], packed["bpo"],
      packed["wvo"])

    policy = slab[:, :A].astype(jnp.float32)
    value = slab[:, A:A + 1].astype(jnp.float32)
    return policy, value


# -----------------------------------------------------------------------------
# Init (deterministic stand-ins for PyTorch defaults) and reference
# -----------------------------------------------------------------------------
def _kaiming_uniform(key, fan_in, fan_out):
    bound = math.sqrt(2.0) * math.sqrt(3.0 / fan_in)   # sqrt(6 / fan_in)
    return jax.random.uniform(
        key, (fan_in, fan_out), jnp.float32, minval=-bound, maxval=bound)


def _bias_init(key, fan_in, fan_out):
    bound = 1.0 / math.sqrt(fan_in)
    return jax.random.uniform(
        key, (1, fan_out), jnp.float32, minval=-bound, maxval=bound)


def init_params(key, status_size, action_size, hidden_size=128):
    keys = jax.random.split(key, 12)
    p = {}
    p["w1"] = _kaiming_uniform(keys[0], status_size, hidden_size)
    p["b1"] = _bias_init(keys[1], status_size, hidden_size)
    p["w2"] = _kaiming_uniform(keys[2], hidden_size, hidden_size)
    p["b2"] = _bias_init(keys[3], hidden_size, hidden_size)
    p["wpp"] = _kaiming_uniform(keys[4], hidden_size, hidden_size)
    p["bpp"] = _bias_init(keys[5], hidden_size, hidden_size)
    p["wpo"] = _kaiming_uniform(keys[6], hidden_size, action_size)
    p["bpo"] = _bias_init(keys[7], hidden_size, action_size)
    p["wvp"] = _kaiming_uniform(keys[8], hidden_size, hidden_size)
    p["bvp"] = _bias_init(keys[9], hidden_size, hidden_size)
    p["wvo"] = _kaiming_uniform(keys[10], hidden_size, 1)
    p["bvo"] = _bias_init(keys[11], hidden_size, 1)
    return p


def _reference_forward(x_img, p):
    """Pure-JAX reference using the same bf16-input / f32-accumulate scheme."""
    bf = jnp.bfloat16

    def lrelu(z):
        return jnp.where(z >= 0, z, NEG_SLOPE * z)

    def mm(a, w):
        return jnp.dot(a.astype(bf), w.astype(bf),
                       preferred_element_type=jnp.float32)

    if x_img.ndim == 3:
        x_img = x_img[None]
    x = (x_img - 0.5) / 0.5                      # transforms.Normalize(0.5, 0.5)
    x = x.reshape(x.shape[0], -1)
    h = lrelu(mm(x, p["w1"]) + p["b1"])
    h = lrelu(mm(h, p["w2"]) + p["b2"])
    pol = mm(lrelu(mm(h, p["wpp"]) + p["bpp"]), p["wpo"]) + p["bpo"]
    val = mm(lrelu(mm(h, p["wvp"]) + p["bvp"]), p["wvo"]) + p["bvo"]
    return pol, val


if __name__ == "__main__":
    key = jax.random.PRNGKey(0)
    k_params, k_x1, k_x2 = jax.random.split(key, 3)

    channels, spatial = 4, 16
    status_size = channels * spatial * spatial       # flattened image -> 1024
    action_size = 4
    hidden_size = 128                                # module default

    params = init_params(k_params, status_size, action_size, hidden_size)
    packed = pack_params(params)

    def check(x, atol=2e-2, rtol=2e-2):
        pol, val = policy_net_forward(x, packed)
        jax.block_until_ready((pol, val))
        ref_pol, ref_val = _reference_forward(x, params)
        b = ref_pol.shape[0]
        assert pol.shape == (b, action_size) and val.shape == (b, 1)
        assert jnp.allclose(pol, ref_pol, atol=atol, rtol=rtol)
        assert jnp.allclose(val, ref_val, atol=atol, rtol=rtol)

    # small batch, image-shaped input as in PolicyNet2D
    x_small = jax.random.uniform(k_x1, (2, channels, spatial, spatial), jnp.float32)
    check(x_small)

    # 3-D input exercises the unsqueeze path
    check(x_small[0])

    # odd batch: >1 grid steps + masked boundary tile
    x_big = jax.random.uniform(k_x2, (37, channels, spatial, spatial), jnp.float32)
    check(x_big)

    print("KERNEL_OK")
</pallas_src>

<mosaic_0001>
module attributes {stable_mosaic.version = 11 : i64} {
  func.func @_policy_net_kernel(%arg0: i32, %arg1: memref<2x1024xf32, #tpu.memory_space<vmem>>, %arg2: memref<1024x128xbf16, #tpu.memory_space<vmem>>, %arg3: memref<1x128xf32, #tpu.memory_space<vmem>>, %arg4: memref<128x128xbf16, #tpu.memory_space<vmem>>, %arg5: memref<1x128xf32, #tpu.memory_space<vmem>>, %arg6: memref<128x256xbf16, #tpu.memory_space<vmem>>, %arg7: memref<1x256xf32, #tpu.memory_space<vmem>>, %arg8: memref<128x128xbf16, #tpu.memory_space<vmem>>, %arg9: memref<1x128xf32, #tpu.memory_space<vmem>>, %arg10: memref<1x128xf32, #tpu.memory_space<vmem>>, %arg11: memref<2x128xbf16, #tpu.memory_space<vmem>>) attributes {dimension_semantics = [#tpu.dimension_semantics<parallel>], iteration_bounds = array<i64: 1>, scalar_prefetch = 0 : i64, scratch_operands = 0 : i64, tpu.core_type = #tpu.core_type<tc>, window_params = [{transform_indices = @transform_0, window_bounds = array<i64: 2, 1024>}, {pipeline_mode = #tpu.pipeline_mode<synchronous>, transform_indices = @transform_1, window_bounds = array<i64: 1024, 128>}, {pipeline_mode = #tpu.pipeline_mode<synchronous>, transform_indices = @transform_2, window_bounds = array<i64: 1, 128>}, {pipeline_mode = #tpu.pipeline_mode<synchronous>, transform_indices = @transform_3, window_bounds = array<i64: 128, 128>}, {pipeline_mode = #tpu.pipeline_mode<synchronous>, transform_indices = @transform_4, window_bounds = array<i64: 1, 128>}, {pipeline_mode = #tpu.pipeline_mode<synchronous>, transform_indices = @transform_5, window_bounds = array<i64: 128, 256>}, {pipeline_mode = #tpu.pipeline_mode<synchronous>, transform_indices = @transform_6, window_bounds = array<i64: 1, 256>}, {pipeline_mode = #tpu.pipeline_mode<synchronous>, transform_indices = @transform_7, window_bounds = array<i64: 128, 128>}, {pipeline_mode = #tpu.pipeline_mode<synchronous>, transform_indices = @transform_8, window_bounds = array<i64: 1, 128>}, {pipeline_mode = #tpu.pipeline_mode<synchronous>, transform_indices = @transform_9, window_bounds = array<i64: 1, 128>}, {transform_indices = @transform_10, window_bounds = array<i64: 2, 128>}]} {
    %c0 = arith.constant 0 : index
    %c0_0 = arith.constant 0 : index
    %0 = vector.load %arg1[%c0, %c0_0] : memref<2x1024xf32, #tpu.memory_space<vmem>>, vector<2x1024xf32>
    %cst = arith.constant 2.000000e+00 : f32
    %1 = vector.broadcast %cst : f32 to vector<2x1024xf32>
    %2 = arith.mulf %0, %1 : vector<2x1024xf32>
    %cst_1 = arith.constant 1.000000e+00 : f32
    %3 = vector.broadcast %cst_1 : f32 to vector<2x1024xf32>
    %4 = arith.subf %2, %3 : vector<2x1024xf32>
    %5 = arith.truncf %4 : vector<2x1024xf32> to vector<2x1024xbf16>
    %c0_2 = arith.constant 0 : index
    %c0_3 = arith.constant 0 : index
    %6 = vector.load %arg2[%c0_2, %c0_3] : memref<1024x128xbf16, #tpu.memory_space<vmem>>, vector<1024x128xbf16>
    %cst_4 = arith.constant dense<0.000000e+00> : vector<2x128xf32>
    %7 = tpu.matmul %5, %6, %cst_4 {dimension_numbers = #tpu.dot_dimension_numbers<[1], [0], [0], [1], [0, 0, 1, 1], [], []>} : vector<2x1024xbf16>, vector<1024x128xbf16>, vector<2x128xf32> -> vector<2x128xf32>
    %c0_5 = arith.constant 0 : index
    %c0_6 = arith.constant 0 : index
    %8 = vector.load %arg3[%c0_5, %c0_6] : memref<1x128xf32, #tpu.memory_space<vmem>>, vector<1x128xf32>
    %9 = vector.broadcast %8 : vector<1x128xf32> to vector<2x128xf32>
    %10 = arith.addf %7, %9 : vector<2x128xf32>
    %cst_7 = arith.constant 0.000000e+00 : f32
    %11 = vector.broadcast %cst_7 : f32 to vector<2x128xf32>
    %12 = arith.cmpf oge, %10, %11 : vector<2x128xf32>
    %cst_8 = arith.constant 0.00999999977 : f32
    %13 = vector.broadcast %cst_8 : f32 to vector<2x128xf32>
    %14 = arith.mulf %13, %10 : vector<2x128xf32>
    %15 = arith.select %12, %10, %14 : vector<2x128xi1>, vector<2x128xf32>
    %16 = arith.truncf %15 : vector<2x128xf32> to vector<2x128xbf16>
    %c0_9 = arith.constant 0 : index
    %c0_10 = arith.constant 0 : index
    %17 = vector.load %arg4[%c0_9, %c0_10] : memref<128x128xbf16, #tpu.memory_space<vmem>>, vector<128x128xbf16>
    %cst_11 = arith.constant dense<0.000000e+00> : vector<2x128xf32>
    %18 = tpu.matmul %16, %17, %cst_11 {dimension_numbers = #tpu.dot_dimension_numbers<[1], [0], [0], [1], [0, 0, 1, 1], [], []>} : vector<2x128xbf16>, vector<128x128xbf16>, vector<2x128xf32> -> vector<2x128xf32>
    %c0_12 = arith.constant 0 : index
    %c0_13 = arith.constant 0 : index
    %19 = vector.load %arg5[%c0_12, %c0_13] : memref<1x128xf32, #tpu.memory_space<vmem>>, vector<1x128xf32>
    %20 = vector.broadcast %19 : vector<1x128xf32> to vector<2x128xf32>
    %21 = arith.addf %18, %20 : vector<2x128xf32>
    %cst_14 = arith.constant 0.000000e+00 : f32
    %22 = vector.broadcast %cst_14 : f32 to vector<2x128xf32>
    %23 = arith.cmpf oge, %21, %22 : vector<2x128xf32>
    %cst_15 = arith.constant 0.00999999977 : f32
    %24 = vector.broadcast %cst_15 : f32 to vector<2x128xf32>
    %25 = arith.mulf %24, %21 : vector<2x128xf32>
    %26 = arith.select %23, %21, %25 : vector<2x128xi1>, vector<2x128xf32>
    %27 = arith.truncf %26 : vector<2x128xf32> to vector<2x128xbf16>
    %c0_16 = arith.constant 0 : index
    %c0_17 = arith.constant 0 : index
    %28 = vector.load %arg6[%c0_16, %c0_17] : memref<128x256xbf16, #tpu.memory_space<vmem>>, vector<128x256xbf16>
    %cst_18 = arith.constant dense<0.000000e+00> : vector<2x256xf32>
    %29 = tpu.matmul %27, %28, %cst_18 {dimension_numbers = #tpu.dot_dimension_numbers<[1], [0], [0], [1], [0, 0, 1, 1], [], []>} : vector<2x128xbf16>, vector<128x256xbf16>, vector<2x256xf32> -> vector<2x256xf32>
    %c0_19 = arith.constant 0 : index
    %c0_20 = arith.constant 0 : index
    %30 = vector.load %arg7[%c0_19, %c0_20] : memref<1x256xf32, #tpu.memory_space<vmem>>, vector<1x256xf32>
    %31 = vector.broadcast %30 : vector<1x256xf32> to vector<2x256xf32>
    %32 = arith.addf %29, %31 : vector<2x256xf32>
    %cst_21 = arith.constant 0.000000e+00 : f32
    %33 = vector.broadcast %cst_21 : f32 to vector<2x256xf32>
    %34 = arith.cmpf oge, %32, %33 : vector<2x256xf32>
    %cst_22 = arith.constant 0.00999999977 : f32
    %35 = vector.broadcast %cst_22 : f32 to vector<2x256xf32>
    %36 = arith.mulf %35, %32 : vector<2x256xf32>
    %37 = arith.select %34, %32, %36 : vector<2x256xi1>, vector<2x256xf32>
    %38 = vector.extract_strided_slice %37 {offsets = [0, 0], sizes = [2, 128], strides = [1, 1]} : vector<2x256xf32> to vector<2x128xf32>
    %39 = arith.truncf %38 : vector<2x128xf32> to vector<2x128xbf16>
    %c0_23 = arith.constant 0 : index
    %c0_24 = arith.constant 0 : index
    %40 = vector.load %arg8[%c0_23, %c0_24] : memref<128x128xbf16, #tpu.memory_space<vmem>>, vector<128x128xbf16>
    %cst_25 = arith.constant dense<0.000000e+00> : vector<2x128xf32>
    %41 = tpu.matmul %39, %40, %cst_25 {dimension_numbers = #tpu.dot_dimension_numbers<[1], [0], [0], [1], [0, 0, 1, 1], [], []>} : vector<2x128xbf16>, vector<128x128xbf16>, vector<2x128xf32> -> vector<2x128xf32>
    %c0_26 = arith.constant 0 : index
    %c0_27 = arith.constant 0 : index
    %42 = vector.load %arg9[%c0_26, %c0_27] : memref<1x128xf32, #tpu.memory_space<vmem>>, vector<1x128xf32>
    %43 = vector.broadcast %42 : vector<1x128xf32> to vector<2x128xf32>
    %44 = arith.addf %41, %43 : vector<2x128xf32>
    %45 = vector.extract_strided_slice %37 {offsets = [0, 128], sizes = [2, 128], strides = [1, 1]} : vector<2x256xf32> to vector<2x128xf32>
    %c0_28 = arith.constant 0 : index
    %c0_29 = arith.constant 0 : index
    %46 = vector.load %arg10[%c0_28, %c0_29] : memref<1x128xf32, #tpu.memory_space<vmem>>, vector<1x128xf32>
    %47 = vector.broadcast %46 : vector<1x128xf32> to vector<2x128xf32>
    %48 = arith.mulf %45, %47 : vector<2x128xf32>
    %cst_30 = arith.constant dense<0.000000e+00> : vector<2xf32>
    %49 = vector.multi_reduction <add>, %48, %cst_30 [1] : vector<2x128xf32> to vector<2xf32>
    %50 = vector.shape_cast %49 : vector<2xf32> to vector<2x1xf32>
    %51 = tpu.iota {dimensions = array<i32: 1>} : vector<2x128xi32>
    %c4_i32 = arith.constant 4 : i32
    %52 = vector.broadcast %c4_i32 : i32 to vector<2x128xi32>
    %53 = arith.cmpi eq, %51, %52 : vector<2x128xi32>
    %cst_31 = arith.constant 0.000000e+00 : f32
    %54 = vector.shape_cast %50 : vector<2x1xf32> to vector<2x1xf32>
    %55 = vector.broadcast %54 : vector<2x1xf32> to vector<2x128xf32>
    %56 = vector.broadcast %cst_31 : f32 to vector<2x128xf32>
    %57 = arith.select %53, %55, %56 : vector<2x128xi1>, vector<2x128xf32>
    %58 = arith.addf %44, %57 : vector<2x128xf32>
    %59 = arith.truncf %58 : vector<2x128xf32> to vector<2x128xbf16>
    %c0_32 = arith.constant 0 : index
    %c0_33 = arith.constant 0 : index
    %60 = vector.load %arg11[%c0_32, %c0_33] : memref<2x128xbf16, #tpu.memory_space<vmem>>, vector<2x128xbf16>
    tpu.vector_store %arg11[%c0_32, %c0_33], %59 {strides = array<i32>} : memref<2x128xbf16, #tpu.memory_space<vmem>>, vector<2x128xbf16>,
    return
  }
  func.func @transform_0(%arg0: i32) -> (i32, i32) {
    %c0_i32 = arith.constant 0 : i32
    %c0_i32_0 = arith.constant 0 : i32
    return %arg0, %c0_i32 : i32, i32
  }
  func.func @transform_1(%arg0: i32) -> (i32, i32) {
    %c0_i32 = arith.constant 0 : i32
    %c0_i32_0 = arith.constant 0 : i32
    %c0_i32_1 = arith.constant 0 : i32
    return %c0_i32, %c0_i32_0 : i32, i32
  }
  func.func @transform_2(%arg0: i32) -> (i32, i32) {
    %c0_i32 = arith.constant 0 : i32
    %c0_i32_0 = arith.constant 0 : i32
    %c0_i32_1 = arith.constant 0 : i32
    return %c0_i32, %c0_i32_0 : i32, i32
  }
  func.func @transform_3(%arg0: i32) -> (i32, i32) {
    %c0_i32 = arith.constant 0 : i32
    %c0_i32_0 = arith.constant 0 : i32
    %c0_i32_1 = arith.constant 0 : i32
    return %c0_i32, %c0_i32_0 : i32, i32
  }
  func.func @transform_4(%arg0: i32) -> (i32, i32) {
    %c0_i32 = arith.constant 0 : i32
    %c0_i32_0 = arith.constant 0 : i32
    %c0_i32_1 = arith.constant 0 : i32
    return %c0_i32, %c0_i32_0 : i32, i32
  }
  func.func @transform_5(%arg0: i32) -> (i32, i32) {
    %c0_i32 = arith.constant 0 : i32
    %c0_i32_0 = arith.constant 0 : i32
    %c0_i32_1 = arith.constant 0 : i32
    return %c0_i32, %c0_i32_0 : i32, i32
  }
  func.func @transform_6(%arg0: i32) -> (i32, i32) {
    %c0_i32 = arith.constant 0 : i32
    %c0_i32_0 = arith.constant 0 : i32
    %c0_i32_1 = arith.constant 0 : i32
    return %c0_i32, %c0_i32_0 : i32, i32
  }
  func.func @transform_7(%arg0: i32) -> (i32, i32) {
    %c0_i32 = arith.constant 0 : i32
    %c0_i32_0 = arith.constant 0 : i32
    %c0_i32_1 = arith.constant 0 : i32
    return %c0_i32, %c0_i32_0 : i32, i32
  }
  func.func @transform_8(%arg0: i32) -> (i32, i32) {
    %c0_i32 = arith.constant 0 : i32
    %c0_i32_0 = arith.constant 0 : i32
    %c0_i32_1 = arith.constant 0 : i32
    return %c0_i32, %c0_i32_0 : i32, i32
  }
  func.func @transform_9(%arg0: i32) -> (i32, i32) {
    %c0_i32 = arith.constant 0 : i32
    %c0_i32_0 = arith.constant 0 : i32
    %c0_i32_1 = arith.constant 0 : i32
    return %c0_i32, %c0_i32_0 : i32, i32
  }
  func.func @transform_10(%arg0: i32) -> (i32, i32) {
    %c0_i32 = arith.constant 0 : i32
    %c0_i32_0 = arith.constant 0 : i32
    return %arg0, %c0_i32 : i32, i32
  }
}

</mosaic_0001>

<bundles_post_ra>
// kernel: tpu_custom_call.1
= control target key start
LH: loop header
LB: loop body
LE: loop exit
PB: predicated region body
PF: predicated region fallthrough
CT: control target
= control target key end

     0   :  { %15 = vsyncpa [#allocation3], 0  ;;  %s1900_s0 = inlined_call_operand.hbm [shape: f32[2,1024], index: 0, kind: input, shape index: {}]   ;;  %s1901_s1 = inlined_call_operand.hbm [shape: bf16[1024,128], index: 1, kind: input, shape index: {}]   ;;  %s1902_s2 = inlined_call_operand.vmem [shape: f32[1,128], index: 2, kind: input, shape index: {}]   ;;  %s1903_s3 = inlined_call_operand.hbm [shape: bf16[128,128], index: 3, kind: input, shape index: {}]   ;;  %s1904_s4 = inlined_call_operand.vmem [shape: f32[1,128], index: 4, kind: input, shape index: {}]   ;;  %s1905_s5 = inlined_call_operand.hbm [shape: bf16[128,256], index: 5, kind: input, shape index: {}]   ;;  %s1906_s6 = inlined_call_operand.vmem [shape: f32[1,256], index: 6, kind: input, shape index: {}]   ;;  %s1907_s7 = inlined_call_operand.hbm [shape: bf16[128,128], index: 7, kind: input, shape index: {}]   ;;  %s1908_s8 = inlined_call_operand.vmem [shape: f32[1,128], index: 8, kind: input, shape index: {}]   ;;  %s1909_s9 = inlined_call_operand.vmem [shape: f32[1,128], index: 9, kind: input, shape index: {}]   ;;  %s1910_s10 = inlined_call_operand.hbm [shape: bf16[2,128], index: 10, kind: output, shape index: {}]  }
   0x1   :  { %16 = vsyncpa [#allocation6], 0 }
   0x2   :  { %17 = vsyncpa [#allocation9], 0 }
   0x3   :  { %18 = vsyncpa [#allocation4], 0  ;;  %s1756_s13 = smov [#allocation5]  }
   0x4   :  { %s34_s14 = sshll.u32 %s1756_s13, 4  ;;  %s35_s14 = int_to_ptr.vmem [resolvable:$true] %s34_s14 }
   0x5   :  { %s1636_s15 = scalar_lea.vmem %s35_s14, 8192  ;;  %p1641_p1 = scmp.lt.s32.totalorder %s35_s14, %s35_s14 }
   0x6   :  { %p1637_p0 = scmp.ne.s32.totalorder %s35_s14, %s1636_s15  ;;  %p1642_p2 = scmp.lt.s32.totalorder %s1636_s15, %s1636_s15 }
   0x8   :  { %p1643_p3 = por %p1642_p2, %p1641_p1 }
   0xa   :  { %p1644_p4 = pnand %p1643_p3, %p1637_p0 }
   0xc   :  { %1647 = shalt.err (!%p1644_p4)
}
   0xd   :  { %s1757_s16 = smov 64   ;;  %s1758_s17 = smov 4  }
   0xe   :  { %40 = dma.hbm_to_vmem [thread:$0]  %s1901_s1, 8192, %s35_s14, [#allocation6], %s1757_s16, %s1757_s16, %s1758_s17  }
   0xf   :  { %s1759_s20 = smov [#allocation8]  }
  0x10   :  { %s62_s21 = sshll.u32 %s1759_s20, 4  ;;  %s63_s21 = int_to_ptr.vmem [resolvable:$true] %s62_s21 }
  0x11   :  { %s1656_s22 = scalar_lea.vmem %s63_s21, 2048  ;;  %p1661_p6 = scmp.lt.s32.totalorder %s63_s21, %s63_s21 }
  0x12   :  { %p1657_p5 = scmp.ne.s32.totalorder %s63_s21, %s1656_s22  ;;  %p1662_p7 = scmp.lt.s32.totalorder %s1656_s22, %s1656_s22 }
  0x14   :  { %p1663_p8 = por %p1662_p7, %p1661_p6 }
  0x16   :  { %p1664_p9 = pnand %p1663_p8, %p1657_p5 }
  0x18   :  { %1667 = shalt.err (!%p1664_p9)
}
  0x19   :  { %s1760_s23 = smov 128   ;;  %s1761_s24 = smov 8  }
  0x1a   :  { %68 = dma.hbm_to_vmem [thread:$0]  %s1905_s5, 2048, %s63_s21, [#allocation9], %s1760_s23, %s1760_s23, %s1761_s24  }
  0x1b   :  { %s1762_s27 = smov [#allocation2]   ;;  %s1763_s29 = smov [#allocation7]  }
  0x1c   :  { %s25_s28 = sshll.u32 %s1762_s27, 4  ;;  %s48_s1 = sshll.u32 %s1763_s29, 4  ;;  %s26_s28 = int_to_ptr.vmem [resolvable:$true] %s25_s28  ;;  %s49_s1 = int_to_ptr.vmem [resolvable:$true] %s48_s1 }
  0x1d   :  { %s1676_s30 = scalar_lea.vmem %s26_s28, 256  ;;  %p1681_p11 = scmp.lt.s32.totalorder %s26_s28, %s26_s28 }
  0x1e   :  { %p1677_p10 = scmp.ne.s32.totalorder %s26_s28, %s1676_s30  ;;  %p1682_p12 = scmp.lt.s32.totalorder %s1676_s30, %s1676_s30 }
  0x20   :  { %p1683_p13 = por %p1682_p12, %p1681_p11 }
  0x22   :  { %p1684_p0 = pnand %p1683_p13, %p1677_p10 }
  0x24   :  { %1687 = shalt.err (!%p1684_p0)
}
  0x25   :  { %28 = dma.hbm_to_vmem [thread:$0]  %s1900_s0, 256, %s26_s28, [#allocation3]  }
  0x26   :  { %s1696_s13 = scalar_lea.vmem %s49_s1, 1024  ;;  %p1701_p2 = scmp.lt.s32.totalorder %s49_s1, %s49_s1 }
  0x27   :  { %p1697_p1 = scmp.ne.s32.totalorder %s49_s1, %s1696_s13  ;;  %p1702_p3 = scmp.lt.s32.totalorder %s1696_s13, %s1696_s13 }
  0x29   :  { %p1703_p4 = por %p1702_p3, %p1701_p2 }
  0x2b   :  { %p1704_p5 = pnand %p1703_p4, %p1697_p1 }
  0x2d   :  { %1707 = shalt.err (!%p1704_p5)
}
  0x2e   :  { %54 = dma.hbm_to_vmem [thread:$0]  %s1903_s3, 1024, %s49_s1, [#allocation6], %s1757_s16, %s1757_s16, %s1758_s17  }
  0x2f   :  { %s1764_s15 = smov [#allocation10]  }
  0x30   :  { %s76_s18 = sshll.u32 %s1764_s15, 4  ;;  %s77_s18 = int_to_ptr.vmem [resolvable:$true] %s76_s18 }
  0x31   :  { %s1716_s19 = scalar_lea.vmem %s77_s18, 1024  ;;  %p1721_p7 = scmp.lt.s32.totalorder %s77_s18, %s77_s18 }
  0x32   :  { %p1717_p6 = scmp.ne.s32.totalorder %s77_s18, %s1716_s19  ;;  %p1722_p8 = scmp.lt.s32.totalorder %s1716_s19, %s1716_s19 }
  0x34   :  { %p1723_p9 = por %p1722_p8, %p1721_p7 }
  0x36   :  { %p1724_p10 = pnand %p1723_p9, %p1717_p6 }
  0x38   :  { %1727 = shalt.err (!%p1724_p10)
}
  0x39   :  { %82 = dma.hbm_to_vmem [thread:$0]  %s1907_s7, 1024, %s77_s18, [#allocation9], %s1757_s16, %s1757_s16, %s1758_s17  }
  0x3a   :  { %1748 = dma.done.wait [#allocation3], 256  }
  0x3b   :  { %1749 = vsyncadd [#allocation3], 4294967040 }
  0x3c   :  { %1750 = dma.done.wait [#allocation6], 9216  }
  0x3d   :  { %1751 = vsyncadd [#allocation6], 4294958080 }
  0x3e   :  { %1752 = dma.done.wait [#allocation9], 3072  }
  0x3f   :  { %1753 = vsyncadd [#allocation9], 4294964224  ;;  %v1524_v0 = vld [vmem:[#allocation5 + $0x78] sm:$0xff]   ;;  %v1528_v4 = vld [vmem:[#allocation5 + $0x70] sm:$0xff]   ;;  %v1765_v26 = vmov 1983009808   ;;  %v115_v28 = vlaneseq }
  0x40   :  { %v1525_v1 = vld [vmem:[#allocation5 + $0xf8] sm:$0xff]   ;;  %1364 = vmatprep.subr.bf16.mxu0 %v1524_v0  ;;  %v1529_v5 = vld [vmem:[#allocation5 + $0xf0] sm:$0xff]   ;;  %v1532_v8 = vld [vmem:[#allocation5 + $0x68] sm:$0xff]   ;;  %v113_v27 = vunpack.c.l.s4 %v1765_v26  ;;  %vm1767_vm0 = vmmov 0   ;;  %vm1234_vm5 = vcmask 1041408  }
  0x41   :  { %v1526_v2 = vld [vmem:[#allocation5 + $0x38] sm:$0xff]   ;;  %1386 = vmatprep.subr.bf16.mxu1 %v1525_v1  ;;  %v1530_v6 = vld [vmem:[#allocation5 + $0x30] sm:$0xff]   ;;  %v1533_v9 = vld [vmem:[#allocation5 + $0xe8] sm:$0xff]   ;;  %v1850_v34 = vshrl.u32 %v115_v28, 7 }
  0x42   :  { %v1527_v3 = vld [vmem:[#allocation5 + $0xb8] sm:$0xff]   ;;  %1365 = vmatpush3.bf16.msra.mxu0 %v1526_v2  ;;  %v1531_v7 = vld [vmem:[#allocation5 + $0xb0] sm:$0xff]   ;;  %v1534_v10 = vld [vmem:[#allocation5 + $0x28] sm:$0xff]   ;;  %v114_v33 = vunpack.c.0.s8 %v113_v27 }
  0x43   :  { %1387 = vmatpush3.bf16.msra.mxu1 %v1527_v3  ;;  %1366 = vmatprep.subr.bf16.mxu0 %v1528_v4  ;;  %v1535_v11 = vld [vmem:[#allocation5 + $0xa8] sm:$0xff]   ;;  %v1536_v12 = vld [vmem:[#allocation5 + $0x60] sm:$0xff]   ;;  %v1540_v16 = vld [vmem:[#allocation5 + $0x58] sm:$0xff]  }
  0x44   :  { %1388 = vmatprep.subr.bf16.mxu1 %v1529_v5  ;;  %v1537_v13 = vld [vmem:[#allocation5 + $0xe0] sm:$0xff]   ;;  %v1541_v17 = vld [vmem:[#allocation5 + $0xd8] sm:$0xff]   ;;  %v1544_v20 = vld [vmem:[#allocation5 + $0x50] sm:$0xff]   ;;  %v1853_v39 = vsub.s32 %v114_v33, %v1850_v34 }
  0x45   :  { %v1538_v14 = vld [vmem:[#allocation5 + $0x20] sm:$0xff]   ;;  %v1542_v18 = vld [vmem:[#allocation5 + $0x18] sm:$0xff]   ;;  %v1545_v21 = vld [vmem:[#allocation5 + $0xd0] sm:$0xff]  }
  0x46   :  { %1367 = vmatpush3.bf16.msra.mxu0 %v1530_v6  ;;  %v1539_v15 = vld [vmem:[#allocation5 + $0xa0] sm:$0xff]   ;;  %v1543_v19 = vld [vmem:[#allocation5 + $0x98] sm:$0xff]   ;;  %v1546_v22 = vld [vmem:[#allocation5 + $0x10] sm:$0xff]  }
  0x47   :  { %1389 = vmatpush3.bf16.msra.mxu1 %v1531_v7  ;;  %1368 = vmatprep.subr.bf16.mxu0 %v1532_v8  ;;  %v1547_v23 = vld [vmem:[#allocation5 + $0x90] sm:$0xff]   ;;  %v1548_v24 = vld [vmem:[#allocation5 + $0x48] sm:$0xff]   ;;  %v1552_v31 = vld [vmem:[#allocation5 + $0x40] sm:$0xff]  }
  0x48   :  { %1390 = vmatprep.subr.bf16.mxu1 %v1533_v9  ;;  %v1549_v25 = vld [vmem:[#allocation5 + $0xc8] sm:$0xff]   ;;  %v1553_v32 = vld [vmem:[#allocation5 + $0xc0] sm:$0xff]   ;;  %v103_v37 = vld [vmem:[#allocation2] sm:$0xff] }
  0x49   :  { %v1550_v29 = vld [vmem:[#allocation5 + $0x8] sm:$0xff]   ;;  %v1554_v35 = vld [vmem:[#allocation5] sm:$0xff]   ;;  %v105_v38 = vmul.f32 2.0, %v103_v37  ;;  %v1556_v40 = vld [vmem:[#allocation5 + $0x178] sm:$0xff]  }
  0x4a   :  { %1369 = vmatpush3.bf16.msra.mxu0 %v1534_v10  ;;  %v1551_v30 = vld [vmem:[#allocation5 + $0x88] sm:$0xff]   ;;  %v1555_v36 = vld [vmem:[#allocation5 + $0x80] sm:$0xff]   ;;  %v1557_v41 = vld [vmem:[#allocation5 + $0x1f8] sm:$0xff]  }
  0x4b   :  { %1391 = vmatpush3.bf16.msra.mxu1 %v1535_v11  ;;  %1370 = vmatprep.subr.bf16.mxu0 %v1536_v12  ;;  %v1262_v42 = vadd.f32 -1.0, %v105_v38  ;;  %v1558_v48 = vld [vmem:[#allocation5 + $0x138] sm:$0xff]   ;;  %v1560_v53 = vld [vmem:[#allocation5 + $0x170] sm:$0xff]   ;;  %v1564_v58 = vld [vmem:[#allocation5 + $0x168] sm:$0xff]  }
  0x4c   :  { %1392 = vmatprep.subr.bf16.mxu1 %v1537_v13  ;;  %v1559_v51 = vld [vmem:[#allocation5 + $0x1b8] sm:$0xff]   ;;  %v1561_v55 = vld [vmem:[#allocation5 + $0x1f0] sm:$0xff]   ;;  %v1565_v59 = vld [vmem:[#allocation5 + $0x1e8] sm:$0xff]  }
  0x4d   :  { %v118_v43 = vrot.slane %v1262_v42, %v1853_v39  ;;  %v111_v44 = vcombine.high %v1262_v42, %v1262_v42  ;;  %v1562_v56 = vld [vmem:[#allocation5 + $0x130] sm:$0xff]   ;;  %v1566_v60 = vld [vmem:[#allocation5 + $0x128] sm:$0xff]   ;;  %v1568_v62 = vld [vmem:[#allocation5 + $0x160] sm:$0xff]  }
  0x4e   :  { %1371 = vmatpush3.bf16.msra.mxu0 %v1538_v14  ;;  %v1563_v57 = vld [vmem:[#allocation5 + $0x1b0] sm:$0xff]   ;;  %v1567_v61 = vld [vmem:[#allocation5 + $0x1a8] sm:$0xff]   ;;  %v1569_v63 = vld [vmem:[#allocation5 + $0x1e0] sm:$0xff]  }
  0x4f   :  { %1393 = vmatpush3.bf16.msra.mxu1 %v1539_v15  ;;  %1372 = vmatprep.subr.bf16.mxu0 %v1540_v16  ;;  %v126_v45 = vcombine.high %v118_v43, %v118_v43  ;;  %v125_v46 = vrot.slane %v111_v44, %v1853_v39  ;;  %v153_v47 = vpack.c.bf16 %v118_v43, %v118_v43  ;;  %v1570_v0 = vld [vmem:[#allocation5 + $0x120] sm:$0xff]   ;;  %v1572_v2 = vld [vmem:[#allocation5 + $0x158] sm:$0xff]   ;;  %v1576_v6 = vld [vmem:[#allocation5 + $0x150] sm:$0xff]  }
  0x50   :  { %1394 = vmatprep.subr.bf16.mxu1 %v1541_v17  ;;  %v1571_v1 = vld [vmem:[#allocation5 + $0x1a0] sm:$0xff]   ;;  %v1573_v3 = vld [vmem:[#allocation5 + $0x1d8] sm:$0xff]   ;;  %v1577_v7 = vld [vmem:[#allocation5 + $0x1d0] sm:$0xff]  }
  0x51   :  { %v154_v49 = vpack.c.bf16 %v126_v45, %v126_v45  ;;  %v127_v50 = vcombine.high %v125_v46, %v125_v46  ;;  %v155_v52 = vpack.c.bf16 %v125_v46, %v125_v46  ;;  %v1574_v4 = vld [vmem:[#allocation5 + $0x118] sm:$0xff]   ;;  %v1578_v8 = vld [vmem:[#allocation5 + $0x110] sm:$0xff]   ;;  %v1580_v10 = vld [vmem:[#allocation5 + $0x148] sm:$0xff]  }
  0x52   :  { %1373 = vmatpush3.bf16.msra.mxu0 %v1542_v18  ;;  %v1575_v5 = vld [vmem:[#allocation5 + $0x198] sm:$0xff]   ;;  %v1579_v9 = vld [vmem:[#allocation5 + $0x190] sm:$0xff]   ;;  %v1581_v11 = vld [vmem:[#allocation5 + $0x1c8] sm:$0xff]  }
  0x53   :  { %1395 = vmatpush3.bf16.msra.mxu1 %v1543_v19  ;;  %1374 = vmatprep.subr.bf16.mxu0 %v1544_v20  ;;  %v156_v54 = vpack.c.bf16 %v127_v50, %v127_v50  ;;  %v1582_v12 = vld [vmem:[#allocation5 + $0x108] sm:$0xff]   ;;  %v1584_v13 = vld [vmem:[#allocation5 + $0x140] sm:$0xff]   ;;  %v104_v14 = vld [vmem:[#allocation2 + $0x8] sm:$0xff] }
  0x54   :  { %1396 = vmatprep.subr.bf16.mxu1 %v1545_v21  ;;  %712 = vmatprep.mubr.bf16.mxu0 %v154_v49  ;;  %v1583_v15 = vld [vmem:[#allocation5 + $0x188] sm:$0xff]   ;;  %v106_v16 = vmul.f32 2.0, %v104_v14  ;;  %v1585_v17 = vld [vmem:[#allocation5 + $0x1c0] sm:$0xff]   ;;  %v1589_v33 = vld [vmem:[#allocation7 + $0x30] sm:$0xff]  }
  0x55   :  { %752 = vmatprep.mubr.bf16.mxu1 %v156_v54  ;;  %v1586_v18 = vld [vmem:[#allocation5 + $0x100] sm:$0xff]   ;;  %v1592_v37 = vld [vmem:[#allocation7 + $0x18] sm:$0xff]   ;;  %v1593_v38 = vld [vmem:[#allocation7 + $0x10] sm:$0xff]  }
  0x56   :  { %1375 = vmatpush3.bf16.msra.mxu0 %v1546_v22  ;;  %v1263_v19 = vadd.f32 -1.0, %v106_v16  ;;  %v1587_v20 = vld [vmem:[#allocation5 + $0x180] sm:$0xff]   ;;  %v1598_v42 = vld [vmem:[#allocation8 + $0x74] ss:$8 sps:$4 sm:$0xff]   ;;  %v1602_v46 = vld [vmem:[#allocation8 + $0x50] ss:$8 sps:$4 sm:$0xff]  }
  0x57   :  { %1397 = vmatpush3.bf16.msra.mxu1 %v1547_v23  ;;  %1376 = vmatprep.subr.bf16.mxu0 %v1548_v24  ;;  %v1601_v43 = vld [vmem:[#allocation8 + $0x64] ss:$8 sps:$4 sm:$0xff]   ;;  %v1599_v44 = vld [vmem:[#allocation8 + $0x60] ss:$8 sps:$4 sm:$0xff]   ;;  %v1604_v45 = vld [vmem:[#allocation8 + $0x54] ss:$8 sps:$4 sm:$0xff]  }
  0x58   :  { %1398 = vmatprep.subr.bf16.mxu1 %v1549_v25  ;;  %v135_v21 = vrot.slane %v1263_v19, %v1853_v39  ;;  %v128_v22 = vcombine.high %v1263_v19, %v1263_v19  ;;  %v1610_v49 = vld [vmem:[#allocation8 + $0x34] ss:$8 sps:$4 sm:$0xff]   ;;  %v1608_v50 = vld [vmem:[#allocation8 + $0x30] ss:$8 sps:$4 sm:$0xff]   ;;  %v1619_v19 = vld [vmem:[#allocation8 + $0x4] ss:$8 sps:$4 sm:$0xff]  }
  0x5a   :  { %1377 = vmatpush3.bf16.msra.mxu0 %v1550_v29  ;;  %v143_v23 = vcombine.high %v135_v21, %v135_v21  ;;  %v142_v24 = vrot.slane %v128_v22, %v1853_v39  ;;  %v157_v25 = vpack.c.bf16 %v135_v21, %v135_v21  ;;  %v1594_v39 = vld [vmem:[#allocation7 + $0x8] sm:$0xff]   ;;  %v1768_v21 = vmov 0   ;;  %v1620_v22 = vld [vmem:[#allocation10 + $0x38] sm:$0xff]  }
  0x5b   :  { %1399 = vmatpush3.bf16.msra.mxu1 %v1551_v30  ;;  %1378 = vmatprep.subr.bf16.mxu0 %v1552_v31  ;;  %v1588_v31 = vld [vmem:[#allocation7 + $0x38] sm:$0xff]  }
  0x5c   :  { %1400 = vmatprep.subr.bf16.mxu1 %v1553_v32  ;;  %v158_v26 = vpack.c.bf16 %v143_v23, %v143_v23  ;;  %v144_v27 = vcombine.high %v142_v24, %v142_v24  ;;  %v159_v29 = vpack.c.bf16 %v142_v24, %v142_v24  ;;  %v1766_v32 = vmov 0.0   ;;  %v1621_v23 = vld [vmem:[#allocation10 + $0x30] sm:$0xff]   ;;  %v1622_v24 = vld [vmem:[#allocation10 + $0x28] sm:$0xff]  }
  0x5e   :  { %1379 = vmatpush3.bf16.msra.mxu0 %v1554_v35  ;;  %v160_v30 = vpack.c.bf16 %v144_v27, %v144_v27  ;;  %v1590_v35 = vld [vmem:[#allocation7 + $0x28] sm:$0xff]   ;;  %v1625_v27 = vld [vmem:[#allocation10 + $0x10] sm:$0xff]  }
  0x5f   :  { %1401 = vmatpush3.bf16.msra.mxu1 %v1555_v36  ;;  %1408 = vmatprep.subr.bf16.mxu0 %v1556_v40  ;;  %v1591_v36 = vld [vmem:[#allocation7 + $0x20] sm:$0xff]  }
  0x60   :  { %1430 = vmatprep.subr.bf16.mxu1 %v1557_v41  ;;  %v1595_v40 = vld [vmem:[#allocation7] sm:$0xff]   ;;  %v1596_v41 = vld [vmem:[#allocation8 + $0x70] ss:$8 sps:$4 sm:$0xff]  }
  0x61   :  { %713 = vmatmul.mubr.bf16.vlgmr.msra.gmra.mxu0 %v153_v47  ;;  %v1607_v47 = vld [vmem:[#allocation8 + $0x44] ss:$8 sps:$4 sm:$0xff]  }
  0x62   :  { %1409 = vmatpush3.bf16.msra.mxu0 %v1558_v48  ;;  %753 = vmatmul.mubr.bf16.vlgmr.msra.gmra.mxu1 %v155_v52  ;;  %v1605_v48 = vld [vmem:[#allocation8 + $0x40] ss:$8 sps:$4 sm:$0xff]  }
  0x63   :  { %1410 = vmatprep.subr.bf16.mxu0 %v1560_v53  ;;  %1431 = vmatpush3.bf16.msra.mxu1 %v1559_v51  ;;  %v1613_v51 = vld [vmem:[#allocation8 + $0x24] ss:$8 sps:$4 sm:$0xff]   ;;  %v1611_v52 = vld [vmem:[#allocation8 + $0x20] ss:$8 sps:$4 sm:$0xff]  }
  0x64   :  { %1432 = vmatprep.subr.bf16.mxu1 %v1561_v55  ;;  %792 = vmatprep.mubr.bf16.mxu0 %v158_v26  ;;  %v1624_v26 = vld [vmem:[#allocation10 + $0x18] sm:$0xff]  }
  0x65   :  { %832 = vmatprep.mubr.bf16.mxu1 %v160_v30 }
  0x66   :  { %1411 = vmatpush3.bf16.msra.mxu0 %v1562_v56 }
  0x67   :  { %1412 = vmatprep.subr.bf16.mxu0 %v1564_v58  ;;  %1433 = vmatpush3.bf16.msra.mxu1 %v1563_v57 }
  0x68   :  { %1434 = vmatprep.subr.bf16.mxu1 %v1565_v59 }
  0x6a   :  { %1413 = vmatpush3.bf16.msra.mxu0 %v1566_v60 }
  0x6b   :  { %1414 = vmatprep.subr.bf16.mxu0 %v1568_v62  ;;  %1435 = vmatpush3.bf16.msra.mxu1 %v1567_v61  ;;  %v1264_v62 = vld [vmem:[%s1902_s2] ss:$0 sm:$0xff] }
  0x6c   :  { %1436 = vmatprep.subr.bf16.mxu1 %v1569_v63 }
  0x6e   :  { %1415 = vmatpush3.bf16.msra.mxu0 %v1570_v0 }
  0x6f   :  { %1416 = vmatprep.subr.bf16.mxu0 %v1572_v2  ;;  %1437 = vmatpush3.bf16.msra.mxu1 %v1571_v1 }
  0x70   :  { %1438 = vmatprep.subr.bf16.mxu1 %v1573_v3 }
  0x72   :  { %1417 = vmatpush3.bf16.msra.mxu0 %v1574_v4 }
  0x73   :  { %1418 = vmatprep.subr.bf16.mxu0 %v1576_v6  ;;  %1439 = vmatpush3.bf16.msra.mxu1 %v1575_v5 }
  0x74   :  { %1440 = vmatprep.subr.bf16.mxu1 %v1577_v7 }
  0x76   :  { %1419 = vmatpush3.bf16.msra.mxu0 %v1578_v8 }
  0x77   :  { %1420 = vmatprep.subr.bf16.mxu0 %v1580_v10  ;;  %1441 = vmatpush3.bf16.msra.mxu1 %v1579_v9 }
  0x78   :  { %1442 = vmatprep.subr.bf16.mxu1 %v1581_v11 }
  0x7a   :  { %1421 = vmatpush3.bf16.msra.mxu0 %v1582_v12 }
  0x7b   :  { %1422 = vmatprep.subr.bf16.mxu0 %v1584_v13  ;;  %1443 = vmatpush3.bf16.msra.mxu1 %v1583_v15 }
  0x7c   :  { %1444 = vmatprep.subr.bf16.mxu1 %v1585_v17  ;;  %v1616_v17 = vld [vmem:[#allocation8 + $0x14] ss:$8 sps:$4 sm:$0xff]  }
  0x7e   :  { %1423 = vmatpush3.bf16.msra.mxu0 %v1586_v18  ;;  %v1614_v18 = vld [vmem:[#allocation8 + $0x10] ss:$8 sps:$4 sm:$0xff]  }
  0x7f   :  { %1445 = vmatpush3.bf16.msra.mxu1 %v1587_v20  ;;  %1470 = vmatprep.subr.bf16.mxu0 %v1766_v32  ;;  %v1617_v20 = vld [vmem:[#allocation8] ss:$8 sps:$4 sm:$0xff]  }
  0x80   :  { %1067 = vmatprep.subr.bf16.mxu1 %v1598_v42  ;;  %v979_v42 = vsub.s32 0, %v1850_v34 }
  0x81   :  { %793 = vmatmul.mubr.bf16.vlgmr.msra.gmra.mxu0 %v157_v25  ;;  %v1623_v25 = vld [vmem:[#allocation10 + $0x20] sm:$0xff]  }
  0x82   :  { %833 = vmatmul.mubr.bf16.vlgmr.msra.gmra.mxu1 %v159_v29  ;;  %1471 = vmatpush3.bf16.msra.mxu0 %v1588_v31  ;;  %v1329_v29 = vld [vmem:[%s1904_s4] ss:$0 sm:$0xff] }
  0x83   :  { %1472 = vmatprep.subr.bf16.mxu0 %v1766_v32  ;;  %1486 = vmatprep.mubr.msk.bf16.mxu0 %vm1767_vm0, %v1766_v32 }
  0x84   :  { %1068 = vmatpush1.bf16.msra.mxu1 %v1596_v41  ;;  %1099 = vmatprep.mubr.bf16.mxu1 %v1768_v21  ;;  %v1627_v41 = vld [vmem:[#allocation10] sm:$0xff]  }
  0x85   :  { %1069 = vmatprep.subr.bf16.mxu1 %v1601_v43  ;;  %v975_v43 = vld [vmem:[%s1906_s6] sm:$0x3] }
  0x86   :  { %1473 = vmatpush3.bf16.msra.mxu0 %v1589_v33 }
  0x87   :  { %1474 = vmatprep.subr.bf16.mxu0 %v1766_v32 }
  0x88   :  { %1070 = vmatpush1.bf16.msra.mxu1 %v1599_v44  ;;  %v983_v44 = vsub.s32 1, %v1850_v34 }
  0x89   :  { %1071 = vmatprep.subr.bf16.mxu1 %v1604_v45  ;;  %v980_v45 = vrot.slane %v975_v43, %v979_v42 }
  0x8a   :  { %1475 = vmatpush3.bf16.msra.mxu0 %v1590_v35 }
  0x8b   :  { %1476 = vmatprep.subr.bf16.mxu0 %v1766_v32 }
  0x8c   :  { %1072 = vmatpush1.bf16.msra.mxu1 %v1602_v46  ;;  %v984_v46 = vrot.slane %v975_v43, %v983_v44 }
  0x8d   :  { %1073 = vmatprep.subr.bf16.mxu1 %v1607_v47 }
  0x8e   :  { %1477 = vmatpush3.bf16.msra.mxu0 %v1591_v36 }
  0x8f   :  { %1478 = vmatprep.subr.bf16.mxu0 %v1766_v32 }
  0x90   :  { %1074 = vmatpush1.bf16.msra.mxu1 %v1605_v48 }
  0x91   :  { %1075 = vmatprep.subr.bf16.mxu1 %v1610_v49 }
  0x92   :  { %1479 = vmatpush3.bf16.msra.mxu0 %v1592_v37 }
  0x93   :  { %1480 = vmatprep.subr.bf16.mxu0 %v1766_v32 }
  0x94   :  { %1076 = vmatpush1.bf16.msra.mxu1 %v1608_v50 }
  0x95   :  { %1077 = vmatprep.subr.bf16.mxu1 %v1613_v51 }
  0x96   :  { %1481 = vmatpush3.bf16.msra.mxu0 %v1593_v38 }
  0x97   :  { %1482 = vmatprep.subr.bf16.mxu0 %v1766_v32 }
  0x98   :  { %1078 = vmatpush1.bf16.msra.mxu1 %v1611_v52 }
  0x99   :  { %1079 = vmatprep.subr.bf16.mxu1 %v1616_v17 }
  0x9a   :  { %1483 = vmatpush3.bf16.msra.mxu0 %v1594_v39 }
  0x9b   :  { %1484 = vmatprep.subr.bf16.mxu0 %v1766_v32 }
  0x9c   :  { %1080 = vmatpush1.bf16.msra.mxu1 %v1614_v18 }
  0x9d   :  { %1081 = vmatprep.subr.bf16.mxu1 %v1619_v19 }
  0x9e   :  { %1485 = vmatpush3.bf16.msra.mxu0 %v1595_v40  ;;  %v1626_v40 = vld [vmem:[#allocation10 + $0x8] sm:$0xff]  }
  0x9f   :  { %1490 = vmatprep.subr.bf16.mxu0 %v1766_v32 }
  0xa0   :  { %1082 = vmatpush1.bf16.msra.mxu1 %v1617_v20 }
 0x121   :  { %v1380_v53 = vpop.f32.mrf.mxu0 }
 0x122   :  { %v1402_v54 = vpop.f32.mrf.mxu1 }
 0x123   :  { %v1381_v55 = vpop.f32.mrf.mxu0 }
 0x124   :  { %v1403_v56 = vpop.f32.mrf.mxu1  ;;  %v1382_v61 = vadd.f32 %v1381_v55, %v1380_v53 }
 0x125   :  { %v1383_v57 = vpop.f32.mrf.mxu0  ;;  %v1404_v0 = vadd.f32 %v1403_v56, %v1402_v54  ;;  %v1363_v54 = vld [vmem:[%s1909_s9] ss:$0 sm:$0xff]  ;;  %s1769_s9 = smov [#allocation11]  }
 0x126   :  { %v1405_v58 = vpop.f32.mrf.mxu1  ;;  %v715_v63 = vadd.f32 %v1382_v61, %v1264_v62  ;;  %s1251_s24 = sshll.u32 %s1769_s9, 4  ;;  %s1252_s24 = int_to_ptr.vmem [resolvable:$true] %s1251_s24 }
 0x127   :  { %v1384_v59 = vpop.f32.mrf.mxu0  ;;  %s1728_s25 = scalar_lea.vmem %s1252_s24, 16  ;;  %s1732_s26 = scalar_lea.vmem %s1252_s24, 32 }
 0x128   :  { %v1406_v60 = vpop.f32.mrf.mxu1  ;;  %v755_v4 = vadd.f32 %v1404_v0, %v715_v63  ;;  %v1239_v59 = vand.u32 127, %v115_v28  ;;  %p1729_p11 = scmp.ne.s32.totalorder %s1252_s24, %s1728_s25  ;;  %p1733_p12 = scmp.lt.s32.totalorder %s1252_s24, %s1252_s24 }
 0x129   :  { %v1354_v60 = vld [vmem:[%s1908_s8] ss:$0 sm:$0xff]  ;;  %p1734_p13 = scmp.lt.s32.totalorder %s1732_s26, %s1728_s25 }
 0x12a   :  { %vm1240_vm6 = vcmp.eq.s32.totalorder %v1239_v59, 4 }
 0x12b   :  { %p1735_p0 = por %p1734_p13, %p1733_p12 }
 0x12d   :  { %p1736_p1 = pnand %p1735_p0, %p1729_p11 }
 0x141   :  { %v1424_v1 = vpop.f32.mrf.mxu0 }
 0x142   :  { %v1446_v2 = vpop.f32.mrf.mxu1 }
 0x143   :  { %v1425_v3 = vpop.f32.mrf.mxu0 }
 0x144   :  { %v1426_v5 = vadd.f32 %v1425_v3, %v1424_v1  ;;  %v1447_v6 = vpop.f32.mrf.mxu1 }
 0x145   :  { %v1427_v7 = vpop.f32.mrf.mxu0  ;;  %v1448_v9 = vadd.f32 %v1447_v6, %v1446_v2 }
 0x146   :  { %v795_v8 = vadd.f32 %v1426_v5, %v755_v4  ;;  %v1449_v10 = vpop.f32.mrf.mxu1 }
 0x147   :  { %v1428_v11 = vpop.f32.mrf.mxu0 }
 0x148   :  { %v835_v12 = vadd.f32 %v1448_v9, %v795_v8  ;;  %v1450_v13 = vpop.f32.mrf.mxu1 }
 0x14a   :  { %vm840_vm1 = vcmp.ge.f32.partialorder %v835_v12, 0.0  ;;  %v841_v14 = vmul.f32 0.01, %v835_v12 }
 0x14c   :  { %v842_v15 = vsel %vm840_vm1, %v835_v12, %v841_v14 }
 0x14d   :  { %v843_v16 = vpack.c.bf16 %v842_v15, %v842_v15 }
 0x14f   :  { %1487 = vmatmul.mubr.bf16.vlgmr.msra.gmra.mxu0 %v843_v16 }
 0x150   :  { %1506 = vmatprep.mubr.msk.bf16.mxu0 %vm1767_vm0, %v1766_v32  ;;  %1491 = vmatpush3.bf16.msra.mxu0 %v1620_v22 }
 0x151   :  { %1492 = vmatprep.subr.bf16.mxu0 %v1766_v32 }
 0x154   :  { %1493 = vmatpush3.bf16.msra.mxu0 %v1621_v23 }
 0x155   :  { %1494 = vmatprep.subr.bf16.mxu0 %v1766_v32 }
 0x158   :  { %1495 = vmatpush3.bf16.msra.mxu0 %v1622_v24 }
 0x159   :  { %1496 = vmatprep.subr.bf16.mxu0 %v1766_v32 }
 0x15c   :  { %1497 = vmatpush3.bf16.msra.mxu0 %v1623_v25 }
 0x15d   :  { %1498 = vmatprep.subr.bf16.mxu0 %v1766_v32 }
 0x160   :  { %1499 = vmatpush3.bf16.msra.mxu0 %v1624_v26 }
 0x161   :  { %1500 = vmatprep.subr.bf16.mxu0 %v1766_v32 }
 0x164   :  { %1501 = vmatpush3.bf16.msra.mxu0 %v1625_v27 }
 0x165   :  { %1502 = vmatprep.subr.bf16.mxu0 %v1766_v32 }
 0x168   :  { %1503 = vmatpush3.bf16.msra.mxu0 %v1626_v40 }
 0x169   :  { %1504 = vmatprep.subr.bf16.mxu0 %v1766_v32 }
 0x16c   :  { %1505 = vmatpush3.bf16.msra.mxu0 %v1627_v41 }
 0x20f   :  { %v949_v30 = vpop.f32.mrf.mxu0 }
 0x210   :  { %v950_v31 = vadd.f32 %v1329_v29, %v949_v30 }
 0x211   :  { %v1488_v33 = vpop.f32.mrf.mxu0 }
 0x212   :  { %vm955_vm2 = vcmp.ge.f32.partialorder %v950_v31, 0.0  ;;  %v956_v35 = vmul.f32 0.01, %v950_v31 }
 0x213   :  { %v952_v36 = vpop.f32.mrf.mxu0 }
 0x214   :  { %v957_v37 = vsel %vm955_vm2, %v950_v31, %v956_v35 }
 0x215   :  { %v958_v38 = vpack.c.bf16 %v957_v37, %v957_v37  ;;  %v1489_v39 = vpop.f32.mrf.mxu0 }
 0x217   :  { %1100 = vmatmul.mubr.bf16.vlgmr.msra.gmra.mxu1 %v958_v38 }
 0x2d7   :  { %v1101_v47 = vpop.f32.mrf.mxu1 }
 0x2d8   :  { %v1102_v48 = vadd.f32 %v1101_v47, %v980_v45 }
 0x2d9   :  { %v1103_v49 = vpop.f32.mrf.mxu1 }
 0x2da   :  { %vm1108_vm3 = vcmp.ge.f32.partialorder %v1102_v48, 0.0  ;;  %v1110_v50 = vmul.f32 0.01, %v1102_v48  ;;  %v1104_v51 = vadd.f32 %v1103_v49, %v984_v46 }
 0x2db   :  { %v1105_v52 = vpop.f32.mrf.mxu1 }
 0x2dc   :  { %v1112_v32 = vsel %vm1108_vm3, %v1102_v48, %v1110_v50  ;;  %v1111_v53 = vmul.f32 0.01, %v1104_v51  ;;  %vm1109_vm4 = vcmp.ge.f32.partialorder %v1104_v51, 0.0 }
 0x2dd   :  { %v1114_v55 = vpack.c.bf16 %v1112_v32, %v1112_v32  ;;  %v1106_v56 = vpop.f32.mrf.mxu1 }
 0x2de   :  { %v1113_v57 = vsel %vm1109_vm4, %v1104_v51, %v1111_v53 }
 0x2df   :  { %1507 = vmatmul.mubr.bf16.vlgmr.msra.gmra.mxu0 %v1114_v55  ;;  %v1233_v34 = vmul.f32 %v1363_v54, %v1113_v57 }
 0x2e1   :  { %v1235_v58 = vsel %vm1234_vm5, %v1233_v34, 0.0 }
 0x2e2   :  { %1236 = vadd.xlane.f32.xlu0 %v1235_v58 }
 0x36b   :  { %v1237_v61 = vpop.xlane.xlu0 %1236 }
 0x36c   :  { %v1241_v0 = vsel %vm1240_vm6, %v1237_v61, 0.0 }
 0x39f   :  { %v1220_v62 = vpop.f32.mrf.mxu0 }
 0x3a0   :  { %v1221_v63 = vadd.f32 %v1354_v60, %v1220_v62 }
 0x3a1   :  { %v1508_v1 = vpop.f32.mrf.mxu0 }
 0x3a2   :  { %v1242_v2 = vadd.f32 %v1241_v0, %v1221_v63 }
 0x3a3   :  { %v1223_v3 = vpop.f32.mrf.mxu0 }
 0x3a4   :  { %v1243_v4 = vpack.c.bf16 %v1242_v2, %v1242_v2 }
 0x3a5   :  { %v1509_v5 = vpop.f32.mrf.mxu0 }
 0x3a6   :  { %1244 = vst [vmem:[#allocation11] sm:$0x1] %v1243_v4 }
 0x3a7   :  { %1739 = shalt.err (!%p1736_p1)
}
 0x3a8   :  { %1254 = dma.vmem_to_hbm [thread:$0]  %s1252_s24, 16, %s1910_s10, [#allocation4]  }
 0x3a9   :  { %1754 = dma.done.wait [#allocation4], 16  }
 0x3aa   :  { %1755 = vsyncadd [#allocation4], 4294967280 }
 0x3ab   :  { %1258 = vsyncpa [#allocation3], 1 }
 0x3ac   :  { %1259 = vsyncpa [#allocation6], 1 }
 0x3ad   :  { %1260 = vsyncpa [#allocation9], 1 }
 0x3ae   :  { %1261 = vsyncpa [#allocation4], 1 }

</bundles_post_ra>
